<compile_context>
chip_gen: v5e
topology: v5e:2x2
jax: 0.10.0
libtpu: 0.0.40
codegen_flags: <defaults>
</compile_context>

<pallas_src>
import functools

import jax
import jax.numpy as jnp
from jax.experimental import pallas as pl
from jax.experimental.pallas import tpu as pltpu

_BN_EPS = 1e-5


# ------------------------------ in-kernel helpers ------------------------------
def _partial_stats(y):
    """y: (L, C) -> (2, C) stacked [sum ; sum-of-squares] over rows (single sweep)."""
    s = jnp.sum(y, axis=0, keepdims=True)
    ss = jnp.sum(y * y, axis=0, keepdims=True)
    return jnp.concatenate([s, ss], axis=0)


def _norm(h, stats, gamma_beta, cnt, relu):
    """BatchNorm from accumulated [sum; sumsq] stats.  h: (L, C) channels-last."""
    inv_cnt = 1.0 / cnt
    mean = stats[0:1, :] * inv_cnt
    var = stats[1:2, :] * inv_cnt - mean * mean
    inv = jax.lax.rsqrt(var + _BN_EPS)
    out = (h - mean) * (inv * gamma_beta[0:1, :]) + gamma_beta[1:2, :]
    if relu:
        out = jnp.maximum(out, 0.0)
    return out


def _conv_rows(h, w, *, k_size, stride, pad, lout, mm_dtype):
    """1-D conv as ONE im2col matmul.  h: (L, Cin); w: (K*Cin, Cout) -> (Lout, Cout)."""
    cin = h.shape[1]
    if pad > 0:                                   # pad once for the whole tile
        z = jnp.zeros((pad, cin), h.dtype)
        h = jnp.concatenate([z, h, z], axis=0)
    cols = []
    for k in range(k_size):                       # static taps, fused on the lane axis
        if stride == 1:
            cols.append(jax.lax.slice(h, (k, 0), (k + lout, cin)))
        else:
            cols.append(jax.lax.slice(
                h, (k, 0), (k + (lout - 1) * stride + 1, cin), (stride, 1)))
    im2col = jnp.concatenate(cols, axis=1)        # (Lout, K*Cin)
    return jnp.dot(im2col.astype(mm_dtype), w.astype(mm_dtype),
                   preferred_element_type=jnp.float32)


# ---------------------------------- kernels ----------------------------------
def _stats_kernel(x_ref, wsc_ref, s1_ref, ssc_ref, *, apply_shortcut, mm_dtype):
    n = pl.program_id(0)

    @pl.when(n == 0)
    def _():
        s1_ref[...] = jnp.zeros_like(s1_ref)
        ssc_ref[...] = jnp.zeros_like(ssc_ref)

    xb = x_ref[0].T                               # NCL tile -> (L, Cin) channels-last
    s1_ref[...] += _partial_stats(xb)
    if apply_shortcut:
        sc = jnp.dot(xb.astype(mm_dtype), wsc_ref[...].astype(mm_dtype),
                     preferred_element_type=jnp.float32)      # 1x1 shortcut conv
        ssc_ref[...] += _partial_stats(sc)


def _bn_relu_conv_kernel(h_ref, stats_ref, gb_ref, w_ref, y_ref, ystats_ref, *,
                         channels_last, cnt, k_size, stride, pad, lout, mm_dtype):
    n = pl.program_id(0)

    @pl.when(n == 0)
    def _():
        ystats_ref[...] = jnp.zeros_like(ystats_ref)

    h = h_ref[0]
    if not channels_last:
        h = h.T                                   # (L, Cin)
    h = _norm(h, stats_ref[...], gb_ref[...], cnt, relu=True)
    y = _conv_rows(h, w_ref[...], k_size=k_size, stride=stride, pad=pad,
                   lout=lout, mm_dtype=mm_dtype)  # (Lout, Cout) f32
    ystats_ref[...] += _partial_stats(y)          # stats for the NEXT BatchNorm
    y_ref[0] = y.astype(y_ref.dtype)


def _final_kernel(h_ref, stats_ref, gb_ref, w_ref, x_ref, wsc_ref, sstats_ref,
                  gbsc_ref, o_ref, *, cnt, cnt_sc, k_size, pad, lout,
                  apply_shortcut, identity_res, mm_dtype):
    h = _norm(h_ref[0], stats_ref[...], gb_ref[...], cnt, relu=True)
    y = _conv_rows(h, w_ref[...], k_size=k_size, stride=1, pad=pad,
                   lout=lout, mm_dtype=mm_dtype)  # (Lout, Cout)
    if apply_shortcut:
        xb = x_ref[0].T                           # (L, Cin)
        res = jnp.dot(xb.astype(mm_dtype), wsc_ref[...].astype(mm_dtype),
                      preferred_element_type=jnp.float32)
        res = _norm(res, sstats_ref[...], gbsc_ref[...], cnt_sc, relu=False)
        y = y + res
    elif identity_res:
        y = y + x_ref[0].T
    o_ref[0] = y.T.astype(o_ref.dtype)            # NCL output, lane-dense (L on lanes)


# ---------------------------------- wrapper ----------------------------------
def _nbytes(shape):
    b = 4
    for d in shape:
        b *= d
    return b


def _cparams(sem, block_shapes):
    # vmem limit sized to the per-step footprint (double-buffer + headroom),
    # capped at 64 MiB so the same config is valid on v5e/v6e (128 MiB) and v7x (64 MiB).
    est = 3 * sum(_nbytes(s) for s in block_shapes) + (4 << 20)
    return pltpu.CompilerParams(
        dimension_semantics=(sem,),
        vmem_limit_bytes=int(min(max(est, 8 << 20), 64 << 20)))


def _full_spec(shape):
    zeros = (0,) * len(shape)
    return pl.BlockSpec(tuple(shape), lambda i, _z=zeros: _z)


def _batch_spec(shape):
    rest = (0,) * (len(shape) - 1)
    return pl.BlockSpec((1,) + tuple(shape[1:]), lambda i, _r=rest: (i,) + _r)


def basic_block_1d(x_ncl, params, *, stride=1, size=3, res=True,
                   matmul_dtype=jnp.float32):
    """x_ncl: (N, Cin, L) float -> (N, planes, Lout) float32 (PyTorch NCL layout).

    matmul_dtype=jnp.bfloat16 can be used on v6e/v7x for higher MXU throughput
    (f32 accumulation is kept either way).
    """
    f32 = jnp.float32
    n, cin, l = x_ncl.shape
    cout = params["w1"].shape[0]
    pad1 = (size - stride) // 2
    pad2 = (size - 1) // 2
    l1 = (l + 2 * pad1 - size) // stride + 1
    l2 = l1 + 2 * pad2 - size + 1
    l3 = l2 + 2 * pad2 - size + 1

    if res and stride != 1:
        # Mirrors PyTorch: the 1x1 shortcut (stride=1) / identity residual would
        # shape-mismatch against a strided main branch in the reference module too.
        raise ValueError("res=True requires stride == 1 (as in the PyTorch module).")

    apply_shortcut = bool(res and cin != cout)
    identity_res = bool(res and cin == cout)

    x_ncl = x_ncl.astype(f32)

    def repack_conv(w):                            # (Cout, Cin, K) -> (K*Cin, Cout)
        co, ci, k = w.shape
        return jnp.transpose(w, (2, 1, 0)).reshape(k * ci, co).astype(f32)

    w1 = repack_conv(params["w1"])
    w2 = repack_conv(params["w2"])
    w3 = repack_conv(params["w3"])

    def pack_gb(g, b, c):                          # pack gamma/beta into one (2, C)
        return jnp.concatenate([params[g].reshape(1, c),
                                params[b].reshape(1, c)], axis=0).astype(f32)

    p1 = pack_gb("g1", "b1", cin)
    p2 = pack_gb("g2", "b2", cout)
    p3 = pack_gb("g3", "b3", cout)
    if apply_shortcut:
        wsc = params["wsc"][:, :, 0].T.astype(f32)             # (Cin, Cout)
        psc = pack_gb("gsc", "bsc", cout)
    else:
        wsc = jnp.zeros((cin, cout), f32)                      # statically unused
        psc = jnp.concatenate([jnp.ones((1, cout), f32),
                               jnp.zeros((1, cout), f32)], axis=0)

    # ---- call 1: BN1 statistics of x + statistics of the 1x1 shortcut conv ----
    blks1 = [(1, cin, l), (cin, cout), (2, cin), (2, cout)]
    stats_x, stats_sc = pl.pallas_call(
        functools.partial(_stats_kernel, apply_shortcut=apply_shortcut,
                          mm_dtype=matmul_dtype),
        grid=(n,),
        in_specs=[_batch_spec((n, cin, l)), _full_spec((cin, cout))],
        out_specs=(_full_spec((2, cin)), _full_spec((2, cout))),
        out_shape=(jax.ShapeDtypeStruct((2, cin), f32),
                   jax.ShapeDtypeStruct((2, cout), f32)),
        compiler_params=_cparams("arbitrary", blks1),
    )(x_ncl, wsc)

    # ---- call 2: y1 = conv1(relu(bn1(x)))  (+ stats of y1) ----
    blks2 = [(1, cin, l), (2, cin), (2, cin), (size * cin, cout),
             (1, l1, cout), (2, cout)]
    y1, stats_y1 = pl.pallas_call(
        functools.partial(_bn_relu_conv_kernel, channels_last=False,
                          cnt=float(n * l), k_size=size, stride=stride,
                          pad=pad1, lout=l1, mm_dtype=matmul_dtype),
        grid=(n,),
        in_specs=[_batch_spec((n, cin, l)), _full_spec((2, cin)),
                  _full_spec((2, cin)), _full_spec((size * cin, cout))],
        out_specs=(_batch_spec((n, l1, cout)), _full_spec((2, cout))),
        out_shape=(jax.ShapeDtypeStruct((n, l1, cout), f32),
                   jax.ShapeDtypeStruct((2, cout), f32)),
        compiler_params=_cparams("arbitrary", blks2),
    )(x_ncl, stats_x, p1, w1)

    # ---- call 3: y2 = conv2(relu(bn2(y1)))  (+ stats of y2) ----
    blks3 = [(1, l1, cout), (2, cout), (2, cout), (size * cout, cout),
             (1, l2, cout), (2, cout)]
    y2, stats_y2 = pl.pallas_call(
        functools.partial(_bn_relu_conv_kernel, channels_last=True,
                          cnt=float(n * l1), k_size=size, stride=1,
                          pad=pad2, lout=l2, mm_dtype=matmul_dtype),
        grid=(n,),
        in_specs=[_batch_spec((n, l1, cout)), _full_spec((2, cout)),
                  _full_spec((2, cout)), _full_spec((size * cout, cout))],
        out_specs=(_batch_spec((n, l2, cout)), _full_spec((2, cout))),
        out_shape=(jax.ShapeDtypeStruct((n, l2, cout), f32),
                   jax.ShapeDtypeStruct((2, cout), f32)),
        compiler_params=_cparams("arbitrary", blks3),
    )(y1, stats_y1, p2, w2)

    # ---- call 4: out = conv3(relu(bn3(y2))) + shortcut, NCL lane-dense output ----
    blks4 = [(1, l2, cout), (2, cout), (2, cout), (size * cout, cout),
             (1, cin, l), (cin, cout), (2, cout), (2, cout), (1, cout, l3)]
    out = pl.pallas_call(
        functools.partial(_final_kernel, cnt=float(n * l2), cnt_sc=float(n * l),
                          k_size=size, pad=pad2, lout=l3,
                          apply_shortcut=apply_shortcut,
                          identity_res=identity_res, mm_dtype=matmul_dtype),
        grid=(n,),
        in_specs=[_batch_spec((n, l2, cout)), _full_spec((2, cout)),
                  _full_spec((2, cout)), _full_spec((size * cout, cout)),
                  _batch_spec((n, cin, l)), _full_spec((cin, cout)),
                  _full_spec((2, cout)), _full_spec((2, cout))],
        out_specs=_batch_spec((n, cout, l3)),
        out_shape=jax.ShapeDtypeStruct((n, cout, l3), f32),
        compiler_params=_cparams("parallel", blks4),
    )(y2, stats_y2, p3, w3, x_ncl, wsc, stats_sc, psc)

    return out


# --------------- pure-JAX reference (mirrors PyTorch NCL semantics) ---------------
def _ref_forward(x, p, *, stride=1, size=3):
    def bn(h, g, b):
        mean = jnp.mean(h, axis=(0, 2), keepdims=True)
        var = jnp.mean((h - mean) ** 2, axis=(0, 2), keepdims=True)
        return ((h - mean) * jax.lax.rsqrt(var + _BN_EPS)
                * g.reshape(1, -1, 1) + b.reshape(1, -1, 1))

    def conv(h, w, s, pad):
        return jax.lax.conv_general_dilated(
            h, w, (s,), [(pad, pad)], dimension_numbers=("NCH", "OIH", "NCH"))

    pad1 = (size - stride) // 2
    pad2 = (size - 1) // 2
    out = jnp.maximum(bn(x, p["g1"], p["b1"]), 0.0)
    out = conv(out, p["w1"], stride, pad1)
    out = jnp.maximum(bn(out, p["g2"], p["b2"]), 0.0)
    out = conv(out, p["w2"], 1, pad2)
    out = jnp.maximum(bn(out, p["g3"], p["b3"]), 0.0)
    out = conv(out, p["w3"], 1, pad2)
    res = bn(conv(x, p["wsc"], 1, 0), p["gsc"], p["bsc"])
    return out + res


if __name__ == "__main__":
    N, CIN, COUT, L, SIZE, STRIDE = 2, 4, 8, 16, 3, 1

    key = jax.random.PRNGKey(0)
    ks = jax.random.split(key, 12)
    x = jax.random.normal(ks[0], (N, CIN, L), jnp.float32)

    params = dict(
        w1=0.2 * jax.random.normal(ks[1], (COUT, CIN, SIZE), jnp.float32),
        w2=0.2 * jax.random.normal(ks[2], (COUT, COUT, SIZE), jnp.float32),
        w3=0.2 * jax.random.normal(ks[3], (COUT, COUT, SIZE), jnp.float32),
        wsc=0.2 * jax.random.normal(ks[4], (COUT, CIN, 1), jnp.float32),
        g1=1.0 + 0.1 * jax.random.normal(ks[5], (1, CIN), jnp.float32),
        b1=0.1 * jax.random.normal(ks[6], (1, CIN), jnp.float32),
        g2=1.0 + 0.1 * jax.random.normal(ks[7], (1, COUT), jnp.float32),
        b2=0.1 * jax.random.normal(ks[8], (1, COUT), jnp.float32),
        g3=1.0 + 0.1 * jax.random.normal(ks[9], (1, COUT), jnp.float32),
        b3=0.1 * jax.random.normal(ks[10], (1, COUT), jnp.float32),
        gsc=jnp.ones((1, COUT), jnp.float32),
        bsc=jnp.zeros((1, COUT), jnp.float32),
    )

    out = jax.block_until_ready(
        basic_block_1d(x, params, stride=STRIDE, size=SIZE, res=True))
    ref = jax.block_until_ready(_ref_forward(x, params, stride=STRIDE, size=SIZE))

    assert out.shape == (N, COUT, L), out.shape
    err = float(jnp.max(jnp.abs(out - ref)))
    if err < 1e-3:
        print("KERNEL_OK")
    else:
        print(f"MISMATCH max_abs_err={err}")
</pallas_src>

<mosaic_0001>
module attributes {stable_mosaic.version = 11 : i64} {
  func.func @_stats_kernel(%arg0: i32, %arg1: memref<1x4x16xf32, #tpu.memory_space<vmem>>, %arg2: memref<4x8xf32, #tpu.memory_space<vmem>>, %arg3: memref<2x4xf32, #tpu.memory_space<vmem>>, %arg4: memref<2x8xf32, #tpu.memory_space<vmem>>) attributes {dimension_semantics = [#tpu.dimension_semantics<arbitrary>], iteration_bounds = array<i64: 2>, scalar_prefetch = 0 : i64, scratch_operands = 0 : i64, tpu.core_type = #tpu.core_type<tc>, window_params = [{transform_indices = @transform_0, window_bounds = array<i64: 1, 4, 16>}, {pipeline_mode = #tpu.pipeline_mode<synchronous>, transform_indices = @transform_1, window_bounds = array<i64: 4, 8>}, {pipeline_mode = #tpu.pipeline_mode<synchronous>, transform_indices = @transform_2, window_bounds = array<i64: 2, 4>}, {pipeline_mode = #tpu.pipeline_mode<synchronous>, transform_indices = @transform_3, window_bounds = array<i64: 2, 8>}]} {
    %c0_i32 = arith.constant 0 : i32
    %0 = arith.cmpi eq, %arg0, %c0_i32 : i32
    %1 = arith.extui %0 : i1 to i32
    %c0_i32_0 = arith.constant 0 : i32
    %2 = arith.cmpi ne, %1, %c0_i32_0 : i32
    scf.if %2 {
      %cst_17 = arith.constant 0.000000e+00 : f32
      %26 = vector.broadcast %cst_17 : f32 to vector<2x4xf32>
      %c0_18 = arith.constant 0 : index
      %c0_19 = arith.constant 0 : index
      %27 = vector.load %arg3[%c0_18, %c0_19] : memref<2x4xf32, #tpu.memory_space<vmem>>, vector<2x4xf32>
      tpu.vector_store %arg3[%c0_18, %c0_19], %26 {strides = array<i32>} : memref<2x4xf32, #tpu.memory_space<vmem>>, vector<2x4xf32>,
      %cst_20 = arith.constant 0.000000e+00 : f32
      %28 = vector.broadcast %cst_20 : f32 to vector<2x8xf32>
      %c0_21 = arith.constant 0 : index
      %c0_22 = arith.constant 0 : index
      %29 = vector.load %arg4[%c0_21, %c0_22] : memref<2x8xf32, #tpu.memory_space<vmem>>, vector<2x8xf32>
      tpu.vector_store %arg4[%c0_21, %c0_22], %28 {strides = array<i32>} : memref<2x8xf32, #tpu.memory_space<vmem>>, vector<2x8xf32>,
    } else {
    }
    %c0 = arith.constant 0 : index
    %c0_1 = arith.constant 0 : index
    %c0_2 = arith.constant 0 : index
    %3 = vector.load %arg1[%c0, %c0_1, %c0_2] : memref<1x4x16xf32, #tpu.memory_space<vmem>>, vector<1x4x16xf32>
    %4 = vector.shape_cast %3 : vector<1x4x16xf32> to vector<4x16xf32>
    %5 = tpu.transpose %4, [1, 0] : vector<4x16xf32> -> vector<16x4xf32>
    %c0_3 = arith.constant 0 : index
    %c0_4 = arith.constant 0 : index
    %6 = vector.load %arg3[%c0_3, %c0_4] : memref<2x4xf32, #tpu.memory_space<vmem>>, vector<2x4xf32>
    %cst = arith.constant dense<0.000000e+00> : vector<4xf32>
    %7 = vector.multi_reduction <add>, %5, %cst [0] : vector<16x4xf32> to vector<4xf32>
    %8 = vector.shape_cast %7 : vector<4xf32> to vector<1x4xf32>
    %9 = arith.mulf %5, %5 : vector<16x4xf32>
    %cst_5 = arith.constant dense<0.000000e+00> : vector<4xf32>
    %10 = vector.multi_reduction <add>, %9, %cst_5 [0] : vector<16x4xf32> to vector<4xf32>
    %11 = vector.shape_cast %10 : vector<4xf32> to vector<1x4xf32>
    %12 = tpu.concatenate %8, %11 in 0 : vector<1x4xf32>, vector<1x4xf32> -> vector<2x4xf32>
    %13 = arith.addf %6, %12 : vector<2x4xf32>
    %c0_6 = arith.constant 0 : index
    %c0_7 = arith.constant 0 : index
    %14 = vector.load %arg3[%c0_6, %c0_7] : memref<2x4xf32, #tpu.memory_space<vmem>>, vector<2x4xf32>
    tpu.vector_store %arg3[%c0_6, %c0_7], %13 {strides = array<i32>} : memref<2x4xf32, #tpu.memory_space<vmem>>, vector<2x4xf32>,
    %c0_8 = arith.constant 0 : index
    %c0_9 = arith.constant 0 : index
    %15 = vector.load %arg2[%c0_8, %c0_9] : memref<4x8xf32, #tpu.memory_space<vmem>>, vector<4x8xf32>
    %cst_10 = arith.constant dense<0.000000e+00> : vector<16x8xf32>
    %16 = tpu.matmul %5, %15, %cst_10 {dimension_numbers = #tpu.dot_dimension_numbers<[1], [0], [0], [1], [0, 0, 1, 1], [], []>} : vector<16x4xf32>, vector<4x8xf32>, vector<16x8xf32> -> vector<16x8xf32>
    %c0_11 = arith.constant 0 : index
    %c0_12 = arith.constant 0 : index
    %17 = vector.load %arg4[%c0_11, %c0_12] : memref<2x8xf32, #tpu.memory_space<vmem>>, vector<2x8xf32>
    %cst_13 = arith.constant dense<0.000000e+00> : vector<8xf32>
    %18 = vector.multi_reduction <add>, %16, %cst_13 [0] : vector<16x8xf32> to vector<8xf32>
    %19 = vector.shape_cast %18 : vector<8xf32> to vector<1x8xf32>
    %20 = arith.mulf %16, %16 : vector<16x8xf32>
    %cst_14 = arith.constant dense<0.000000e+00> : vector<8xf32>
    %21 = vector.multi_reduction <add>, %20, %cst_14 [0] : vector<16x8xf32> to vector<8xf32>
    %22 = vector.shape_cast %21 : vector<8xf32> to vector<1x8xf32>
    %23 = tpu.concatenate %19, %22 in 0 : vector<1x8xf32>, vector<1x8xf32> -> vector<2x8xf32>
    %24 = arith.addf %17, %23 : vector<2x8xf32>
    %c0_15 = arith.constant 0 : index
    %c0_16 = arith.constant 0 : index
    %25 = vector.load %arg4[%c0_15, %c0_16] : memref<2x8xf32, #tpu.memory_space<vmem>>, vector<2x8xf32>
    tpu.vector_store %arg4[%c0_15, %c0_16], %24 {strides = array<i32>} : memref<2x8xf32, #tpu.memory_space<vmem>>, vector<2x8xf32>,
    return
  }
  func.func @transform_0(%arg0: i32) -> (i32, i32, i32) {
    %c0_i32 = arith.constant 0 : i32
    %c0_i32_0 = arith.constant 0 : i32
    %c0_i32_1 = arith.constant 0 : i32
    return %arg0, %c0_i32, %c0_i32_0 : i32, i32, i32
  }
  func.func @transform_1(%arg0: i32) -> (i32, i32) {
    %c0_i32 = arith.constant 0 : i32
    %c0_i32_0 = arith.constant 0 : i32
    %c0_i32_1 = arith.constant 0 : i32
    return %c0_i32, %c0_i32_0 : i32, i32
  }
  func.func @transform_2(%arg0: i32) -> (i32, i32) {
    %c0_i32 = arith.constant 0 : i32
    %c0_i32_0 = arith.constant 0 : i32
    %c0_i32_1 = arith.constant 0 : i32
    return %c0_i32, %c0_i32_0 : i32, i32
  }
  func.func @transform_3(%arg0: i32) -> (i32, i32) {
    %c0_i32 = arith.constant 0 : i32
    %c0_i32_0 = arith.constant 0 : i32
    %c0_i32_1 = arith.constant 0 : i32
    return %c0_i32, %c0_i32_0 : i32, i32
  }
}

</mosaic_0001>

<bundles_post_ra>
// kernel: tpu_custom_call.1
= control target key start
LH: loop header
LB: loop body
LE: loop exit
PB: predicated region body
PF: predicated region fallthrough
CT: control target
= control target key end

     0   :  { %9 = vsyncpa [#allocation3], 0  ;;  %s807_s0 = inlined_call_operand.hbm [shape: f32[2,4,16], index: 0, kind: input, shape index: {}]   ;;  %s808_s1 = inlined_call_operand.hbm [shape: f32[4,8], index: 1, kind: input, shape index: {}]   ;;  %s809_s2 = inlined_call_operand.hbm [shape: f32[2,4], index: 2, kind: output, shape index: {0}]   ;;  %s810_s3 = inlined_call_operand.hbm [shape: f32[2,8], index: 3, kind: output, shape index: {1}]  }
   0x1   :  { %11 = vsyncpa [#allocation3 + $0x1], 0 }
   0x2   :  { %12 = vsyncpa [#allocation6], 0 }
   0x3   :  { %13 = vsyncpa [#allocation4], 0 }
   0x4   :  { %14 = vsyncpa [#allocation9], 0  ;;  %s685_s12 = smov 0   ;;  %s687_s13 = smov 0  }
   0x5   :  { %s689_s14 = smov 0   ;;  %s691_s15 = smov 0  }
   0x6 LB: > { %s704_s16 = sadd.s32 4294967295, %s659_s15   ;;  %p40_p0 = scmp.ne.s32.totalorder %s651_s13, %s647_s12  ;;  %s659_s15 = sphi %s691_s15, %s817_s15   ;;  %s655_s14 = sphi %s689_s14, %s816_s14   ;;  %s651_s13 = sphi %s687_s13, %s815_s13   ;;  %s647_s12 = sphi %s685_s12, %s814_s12  }
   0x7   : > { %p41_p1 = scmp.eq.s32.totalorder %s704_s16, 0  ;;  %p412_p2 = scmp.ge.s32.totalorder %s659_s15, 1 }
   0x8   : > { %p114_p3 = scmp.lt.s32.totalorder %s659_s15, 3  ;;  %p413_p4 = scmp.ne.s32.totalorder %s704_s16, 0 }
   0x9   : > { %p713_p5 = por %p41_p1, %p40_p0  ;;  %s126_s20 = sshll.u32 %s808_s1, 4  ;;  %s127_s20 = int_to_ptr.hbm [resolvable:$true] %s126_s20 }
   0xa   : > { %p720_p6 = pnand %p412_p2, %p114_p3  ;;  %s661_s22 = smov [#allocation5]  }
   0xb   : > { %s128_s23 = sshll.u32 %s661_s22, 4  ;;  %s729_s24 = sadd.s32 1, %s659_s15   ;;  %s129_s23 = int_to_ptr.vmem [resolvable:$true] %s128_s23 }
   0xc   : > { %p445_p7 = pneg %p720_p6  ;;  %s27_s25 = sadd.s32 1, %s655_s14 }
   0xd   : > { %s24_s26 = ssub.s32 %s659_s15, %s729_s24  ;;  %p34_p10 = scmp.ne.s32.totalorder %s655_s14, %s651_s13 }
   0xe   : > { %p446_p8 = pnand %p445_p7, %p41_p1  ;;  %p25_p9 = scmp.eq.s32.totalorder %s24_s26, 0 }
   0xf   : > { %p35_p11 = scmp.eq.s32.totalorder %s659_s15, 0  ;;  %p454_p12 = scmp.lt.s32.totalorder %s659_s15, 2 }
  0x10   : > { %448 = dma.hbm_to_vmem [thread:$0]  (!%p446_p8), %s127_s20, 64, %s129_s23, [#allocation6]  }
  0x11   : > { %s739_s27 = scalar_select %p25_p9, %s655_s14, %s27_s25  }
  0x12   : > { %p36_p13 = por %p35_p11, %p34_p10  ;;  %s139_s28 = sand.u32 1, %s655_s14  }
  0x13   : > { %s415_s29 = sshll.u32 %s139_s28, 2  ;;  %s416_s30 = sshll.u32 %s659_s15, 2 }
  0x14   : > { %s147_s6 = scalar_lea.hbm %s807_s0, %s416_s30  ;;  %s143_s7 = scalar_lea.vmem [#allocation2], %s415_s29 }
  0x15   : > { %s151_s8 = sshll.u32 %s143_s7, 4  ;;  %s149_s9 = sshll.u32 %s147_s6, 4  ;;  %s152_s8 = int_to_ptr.vmem [resolvable:$true] %s151_s8  ;;  %s150_s9 = int_to_ptr.hbm [resolvable:$true] %s149_s9 }
  0x16   : > { %p746_p0 = pnand %p454_p12, %p36_p13  ;;  %s140_s11 = scalar_lea.sflag [#allocation3], %s139_s28 }
  0x17   : > { %s527_s12 = sshra.s32 %s150_s9, 4  ;;  %s534_s20 = scalar_lea.hbm %s807_s0, 8  ;;  %s528_s12 = int_to_ptr.hbm [resolvable:$true] %s527_s12 }
  0x18   : > { %s529_s18 = scalar_lea.hbm %s528_s12, 4  ;;  %p531_p3 = pneg %p746_p0 }
  0x19   : > { %p530_p2 = scmp.ne.s32.totalorder %s528_s12, %s529_s18  ;;  %p535_p9 = scmp.lt.s32.totalorder %s528_s12, %s807_s0 }
  0x1a   : > { %p536_p10 = scmp.lt.s32.totalorder %s534_s20, %s529_s18 }
  0x1b   : > { %p532_p7 = pnand %p531_p3, %p530_p2 }
  0x1c   : > { %p537_p11 = por %p536_p10, %p535_p9 }
  0x1d   : > { %p533_p8 = pneg %p532_p7 }
  0x1f   : > { %p538_p12 = pnand %p537_p11, %p533_p8 }
  0x21   : > { %541 = shalt.err (!%p538_p12)
}
  0x22   : > { %452 = dma.hbm_to_vmem [thread:$0]  (!%p746_p0), %s150_s9, 64, %s152_s8, %s140_s11  }
  0x23   : > { %160 = sbr.rel (%p720_p6) target bundleno = 377 (0x179), region = 28  ;;  %s162_s25 = sand.u32 (!%p720_p6), 1, %s651_s13  }
  0x24   : > { %s418_s26 = sshll.u32 (!%p720_p6), %s162_s25, 2  ;;  %s163_s28 = scalar_lea.sflag (!%p720_p6), [#allocation3], %s162_s25 }
  0x25   : > { %s166_s29 = scalar_lea.vmem (!%p720_p6), [#allocation2], %s418_s26 }
  0x28   : > { %630 = dma.done.wait (%p713_p5), %s163_s28, 64  }
  0x29   : > { %632 = vsyncadd (%p713_p5), %s163_s28, 4294967232 }
  0x2a   : > { %634 = dma.done.wait (%p41_p1), [#allocation6], 64  }
  0x2b   : > { %636 = vsyncadd (%p41_p1), [#allocation6], 4294967232  ;;  %193 = sbr.rel (%p413_p4) target bundleno = 51 (0x33), region = 40 }
  0x30   : > { %vm194_vm0 = vcmask 25600   ;;  %vm196_vm1 = vcmask 58368   ;;  %v662_v0 = vmov 0.0  }
  0x31   : > { %195 = vst.msk [vmem:[#allocation7] sm:$0x3] %vm194_vm0, %v662_v0 }
  0x32   : > { %197 = vst.msk [vmem:[#allocation8] sm:$0x3] %vm196_vm1, %v662_v0 }
  0x33 PF: > { %v198_v1 = vld [vmem:[%s166_s29] sm:$0xf]  ;;  %v258_v2 = vld [vmem:[#allocation5] sm:$0xf]  ;;  %vm265_vm2 = vcmask 1043456   ;;  %vm232_vm3 = vcmask 31744  }
  0x34   : > { %199 = vxpose.xlu0.b32.start.end [1/1] (short) (narrow) %v198_v1, 16  ;;  %421 = vmatpush.msk.msra.mxu0 %vm265_vm2, %v258_v2  ;;  %vm253_vm4 = vcmask 1040384   ;;  %s663_s17 = smov [#allocation7]   ;;  %s326_s5 = sshll.u32 %s809_s2, 4  ;;  %vm256_vm5 = vcmask 25600   ;;  %vm293_vm6 = vcmask 64512   ;;  %s327_s5 = int_to_ptr.hbm [resolvable:$true] %s326_s5 }
  0x35   : > { %430 = vmatpush.msk.msra.mxu1 %vm265_vm2, %v258_v2  ;;  %s324_s21 = sshll.u32 %s663_s17, 4  ;;  %p456_p1 = scmp.eq.s32.totalorder %s704_s16, 1  ;;  %vm316_vm7 = vcmask 58368   ;;  %s325_s21 = int_to_ptr.vmem [resolvable:$true] %s324_s21 }
  0x36   : > { %s664_s6 = smov [#allocation8]   ;;  %s338_s10 = sshll.u32 %s810_s3, 4  ;;  %s339_s10 = int_to_ptr.hbm [resolvable:$true] %s338_s10 }
  0x37   : > { %s336_s7 = sshll.u32 %s664_s6, 4  ;;  %s337_s7 = int_to_ptr.vmem [resolvable:$true] %s336_s7 }
  0x38   : > { %v231_v25 = vld [vmem:[#allocation7] sm:$0x3] }
  0x39   : > { %v292_v50 = vld [vmem:[#allocation8] sm:$0x3] }
  0xd8   : > { %v215_v3 = vpop.trf.xlu0 }
  0xd9   : > { %422 = vmatmul.msk.f32.vlgmr.msra.gmra.mxu0 %vm232_vm3, %v215_v3  ;;  %v242_v4 = vmul.f32 %v215_v3, %v215_v3  ;;  %v233_v6 = vsel %vm232_vm3, %v215_v3, 0.0 }
  0xdb   : > { %v244_v10 = vsel %vm232_vm3, %v242_v4, 0.0 }
  0xe0   : > { %v216_v5 = vpop.trf.xlu0 }
  0xe1   : > { %v234_v7 = vsel %vm232_vm3, %v216_v5, 0.0  ;;  %v243_v8 = vmul.f32 %v216_v5, %v216_v5  ;;  %423 = vmatmul.msk.f32.vlgmr.msra.gmra.mxu1 %vm232_vm3, %v216_v5 }
  0xe2   : > { %v235_v9 = vadd.f32 %v234_v7, %v233_v6 }
  0xe3   : > { %v245_v11 = vsel %vm232_vm3, %v243_v8, 0.0 }
  0xe4   : > { %v236_v12 = vrot.slane %v235_v9, 4  ;;  %v246_v13 = vadd.f32 %v245_v11, %v244_v10 }
  0xe6   : > { %v237_v14 = vadd.f32 %v236_v12, %v235_v9  ;;  %v247_v15 = vrot.slane %v246_v13, 4 }
  0xe8   : > { %v238_v16 = vrot.slane %v237_v14, 2  ;;  %v248_v17 = vadd.f32 %v247_v15, %v246_v13 }
  0xea   : > { %v239_v18 = vadd.f32 %v238_v16, %v237_v14  ;;  %v249_v19 = vrot.slane %v248_v17, 2 }
  0xec   : > { %v240_v20 = vrot.slane %v239_v18, 1  ;;  %v250_v21 = vadd.f32 %v249_v19, %v248_v17 }
  0xee   : > { %v251_v22 = vrot.slane %v250_v21, 1  ;;  %v241_v23 = vadd.f32 %v240_v20, %v239_v18 }
  0xf0   : > { %v252_v24 = vadd.f32 %v251_v22, %v250_v21 }
  0xf2   : > { %v254_v26 = vsel %vm253_vm4, %v241_v23, %v252_v24 }
  0xf3   : > { %v255_v27 = vadd.f32 %v254_v26, %v231_v25 }
  0xf5   : > { %257 = vst.msk [vmem:[#allocation7] sm:$0x3] %vm256_vm5, %v255_v27 }
  0xf6   : > { %438 = dma.vmem_to_hbm [thread:$0]  (%p456_p1), %s325_s21, 32, %s327_s5, [#allocation4]  }
 0x156   : > { %v286_v28 = vpop.f32.mrf.mxu0 }
 0x157   : > { %v303_v29 = vmul.f32 %v286_v28, %v286_v28  ;;  %v294_v31 = vsel %vm293_vm6, %v286_v28, 0.0 }
 0x159   : > { %v305_v35 = vsel %vm293_vm6, %v303_v29, 0.0 }
 0x15e   : > { %v289_v30 = vpop.f32.mrf.mxu1 }
 0x15f   : > { %v295_v32 = vsel %vm293_vm6, %v289_v30, 0.0  ;;  %v304_v33 = vmul.f32 %v289_v30, %v289_v30 }
 0x160   : > { %v296_v34 = vadd.f32 %v295_v32, %v294_v31 }
 0x161   : > { %v306_v36 = vsel %vm293_vm6, %v304_v33, 0.0 }
 0x162   : > { %v297_v37 = vrot.slane %v296_v34, 4  ;;  %v307_v38 = vadd.f32 %v306_v36, %v305_v35 }
 0x164   : > { %v298_v39 = vadd.f32 %v297_v37, %v296_v34  ;;  %v308_v40 = vrot.slane %v307_v38, 4 }
 0x166   : > { %v299_v41 = vrot.slane %v298_v39, 2  ;;  %v309_v42 = vadd.f32 %v308_v40, %v307_v38 }
 0x168   : > { %v300_v43 = vadd.f32 %v299_v41, %v298_v39  ;;  %v310_v44 = vrot.slane %v309_v42, 2 }
 0x16a   : > { %v301_v45 = vrot.slane %v300_v43, 1  ;;  %v311_v46 = vadd.f32 %v310_v44, %v309_v42 }
 0x16c   : > { %v312_v47 = vrot.slane %v311_v46, 1  ;;  %v302_v48 = vadd.f32 %v301_v45, %v300_v43 }
 0x16e   : > { %v313_v49 = vadd.f32 %v312_v47, %v311_v46 }
 0x170   : > { %v314_v51 = vsel %vm253_vm4, %v302_v48, %v313_v49 }
 0x171   : > { %v315_v52 = vadd.f32 %v314_v51, %v292_v50 }
 0x173   : > { %317 = vst.msk [vmem:[#allocation8] sm:$0x3] %vm316_vm7, %v315_v52 }
 0x174   : > { %440 = dma.vmem_to_hbm [thread:$0]  (%p456_p1), %s337_s7, 32, %s339_s10, [#allocation9]  }
 0x175   : > { %638 = dma.done.wait (%p456_p1), [#allocation4], 32  }
 0x176   : > { %640 = vsyncadd (%p456_p1), [#allocation4], 4294967264 }
 0x177   : > { %642 = dma.done.wait (%p456_p1), [#allocation9], 32  }
 0x178   : > { %644 = vsyncadd (%p456_p1), [#allocation9], 4294967264 }
 0x179 PF: > { %p17_p4 = scmp.ge.s32.totalorder %s729_s24, 4   ;;  %s814_s12 = smov %s651_s13 }
 0x17a   : > { %s815_s13 = smov %s655_s14  ;;  %s816_s14 = smov %s739_s27 }
 0x17b   : > { %s817_s15 = smov %s729_s24  ;;  %19 = sbr.rel (!%p17_p4) target bundleno = 6 (0x6), region = 81 }
 0x180   :  { %357 = vsyncpa [#allocation3], 1 }
 0x181   :  { %359 = vsyncpa [#allocation3 + $0x1], 1 }
 0x182   :  { %360 = vsyncpa [#allocation6], 1 }
 0x183   :  { %361 = vsyncpa [#allocation4], 1 }
 0x184   :  { %363 = vsyncpa [#allocation4 + $0x1], 1 }
 0x185   :  { %364 = vsyncpa [#allocation9], 1 }

</bundles_post_ra>
